<compile_context>
chip_gen: v6e
topology: v6e:2x2x1
jax: 0.10.0
libtpu: 0.0.40
codegen_flags: <defaults>
</compile_context>

<pallas_src>
import jax
import jax.numpy as jnp
from jax.experimental import pallas as pl
from jax.experimental.pallas import tpu as pltpu

_LANE = 128
_TARGET_BLOCK_BYTES = 2 * 1024 * 1024  # ~2 MiB per block (x4 resident, double-buffered in+out)


def _copy_kernel(x_ref, o_ref):
    # Pure identity: the data movement of a contiguous view.
    o_ref[...] = x_ref[...]


def _native_sublane(dtype):
    """Native packed sublane count: 8 for 32-bit, 16 for 16-bit, 32 for 8-bit."""
    itemsize = jnp.dtype(dtype).itemsize
    return max(8, 32 // max(itemsize, 1))


def _choose_lanes(n, sublane):
    """Widest lane-dense last dim (multiple of 128) dividing n into sublane-aligned rows."""
    for c in (4096, 2048, 1024, 512, 256, 128):
        if n % (c * sublane) == 0:
            return c
    return _LANE  # unreachable when n is a multiple of sublane * 128


def _pallas_identity_copy(flat, sublane):
    """Identity-copy a 1-D contiguous array through VMEM in large lane-dense blocks.

    `flat.size` must be a (non-zero) multiple of sublane * 128.
    """
    n = flat.size
    dtype = flat.dtype
    itemsize = jnp.dtype(dtype).itemsize

    lanes = _choose_lanes(n, sublane)
    rows = n // lanes

    # ~2 MiB blocks, rounded to the native sublane multiple.  Double-buffered
    # input + output => ~8 MiB resident, safely under the scoped-VMEM defaults
    # of v5e (16 MiB), v6e (32 MiB) and v7x (32 MiB of 64 MiB physical).
    tile_r = _TARGET_BLOCK_BYTES // (lanes * itemsize)
    tile_r = max(sublane, (tile_r // sublane) * sublane)
    tile_r = min(tile_r, rows)

    x2d = jnp.reshape(flat, (rows, lanes))
    grid = (pl.cdiv(rows, tile_r),)

    y2d = pl.pallas_call(
        _copy_kernel,
        out_shape=jax.ShapeDtypeStruct((rows, lanes), dtype),
        grid=grid,
        in_specs=[pl.BlockSpec((tile_r, lanes), lambda i: (i, 0))],
        out_specs=pl.BlockSpec((tile_r, lanes), lambda i: (i, 0)),
        # `view` is metadata-only in torch: alias the input buffer so the copy
        # does not allocate + fill a second full-size HBM array when possible.
        input_output_aliases={0: 0},
        compiler_params=pltpu.CompilerParams(
            dimension_semantics=("parallel",),  # lets v7x shard the grid on 2 TCs
            vmem_limit_bytes=32 * 1024 * 1024,
        ),
        cost_estimate=pl.CostEstimate(
            flops=0, transcendentals=0, bytes_accessed=2 * n * itemsize),
    )(x2d)
    return jnp.reshape(y2d, (-1,))


def _resolve_shape(total, shape):
    """Resolve a single -1 in the target shape, like torch.view."""
    shape = list(shape)
    if -1 in shape:
        idx = shape.index(-1)
        known = 1
        for j, s in enumerate(shape):
            if j != idx:
                known *= s
        assert total % known == 0, "view shape incompatible with numel"
        shape[idx] = total // known
    prod = 1
    for s in shape:
        prod *= s
    assert prod == total, "view shape incompatible with numel"
    return tuple(shape)


class View:
    """JAX/Pallas equivalent of the PyTorch View module: x.view(*shape)."""

    def __init__(self, shape):
        self.shape = tuple(shape)

    def __call__(self, x):
        total = x.size
        out_shape = _resolve_shape(total, self.shape)
        sublane = _native_sublane(x.dtype)
        tile_elems = sublane * _LANE

        # Contiguous row-major flatten (== torch .contiguous() memory order).
        flat = jnp.reshape(x, (-1,))

        n_main = (total // tile_elems) * tile_elems
        if n_main == 0:
            # Smaller than one native (sublane, 128) tile: the view is
            # metadata-only anyway; stay in plain JAX.
            return jnp.reshape(flat, out_shape)

        main = _pallas_identity_copy(flat[:n_main], sublane)
        if n_main != total:
            # Ragged tail (< one native tile) handled in plain JAX instead of
            # materializing a padded full-size HBM array.
            main = jnp.concatenate([main, flat[n_main:]])

        # Metadata-only reshape to the requested view shape (free).
        return jnp.reshape(main, out_shape)


if __name__ == "__main__":
    key = jax.random.PRNGKey(0)
    # NCHW input, as a PyTorch conv feature map would be.
    x = jax.random.normal(key, (2, 4, 16, 16), dtype=jnp.float32)

    # Typical usage: flatten conv features per batch element.
    view = View((2, -1))
    y = jax.jit(view)(x)
    y = jax.block_until_ready(y)

    # Correctness check against the pure-JAX reference (torch semantics:
    # contiguous row-major reshape).
    ref = jnp.reshape(x, (2, -1))
    assert y.shape == (2, 4 * 16 * 16)
    assert y.dtype == x.dtype
    assert bool(jnp.all(y == ref))

    print("KERNEL_OK")
</pallas_src>

<mosaic_0001>
module attributes {stable_mosaic.version = 11 : i64} {
  func.func @_copy_kernel(%arg0: i32, %arg1: memref<8x256xf32, #tpu.memory_space<vmem>>, %arg2: memref<8x256xf32, #tpu.memory_space<vmem>>) attributes {dimension_semantics = [#tpu.dimension_semantics<parallel>], iteration_bounds = array<i64: 1>, scalar_prefetch = 0 : i64, scratch_operands = 0 : i64, tpu.core_type = #tpu.core_type<tc>, window_params = [{transform_indices = @transform_0, window_bounds = array<i64: 8, 256>}, {transform_indices = @transform_1, window_bounds = array<i64: 8, 256>}]} {
    %c0 = arith.constant 0 : index
    %c0_0 = arith.constant 0 : index
    %0 = vector.load %arg1[%c0, %c0_0] : memref<8x256xf32, #tpu.memory_space<vmem>>, vector<8x256xf32>
    %c0_1 = arith.constant 0 : index
    %c0_2 = arith.constant 0 : index
    %1 = vector.load %arg2[%c0_1, %c0_2] : memref<8x256xf32, #tpu.memory_space<vmem>>, vector<8x256xf32>
    tpu.vector_store %arg2[%c0_1, %c0_2], %0 {strides = array<i32>} : memref<8x256xf32, #tpu.memory_space<vmem>>, vector<8x256xf32>,
    return
  }
  func.func @transform_0(%arg0: i32) -> (i32, i32) {
    %c0_i32 = arith.constant 0 : i32
    %c0_i32_0 = arith.constant 0 : i32
    return %arg0, %c0_i32 : i32, i32
  }
  func.func @transform_1(%arg0: i32) -> (i32, i32) {
    %c0_i32 = arith.constant 0 : i32
    %c0_i32_0 = arith.constant 0 : i32
    return %arg0, %c0_i32 : i32, i32
  }
}

</mosaic_0001>

<bundles_post_ra>
// kernel: _unnamed_function_.1
= control target key start
LH: loop header
LB: loop body
LE: loop exit
PB: predicated region body
PF: predicated region fallthrough
CT: control target
= control target key end

     0   :  { %s38_s0 = inlined_call_operand.vmem [shape: f32[8,256], index: 0, kind: input, shape index: {}, may-alias: {0,1}]   ;;  %s39_s1 = inlined_call_operand.vmem [shape: f32[8,256], index: 1, kind: output, shape index: {}, may-alias: {0,1}]  }
   0x1   :  { %v8_v0 = vld [vmem:[%s38_s0] sm:$0xff]  ;;  %v9_v1 = vld [vmem:[%s38_s0 + $0x8] sm:$0xff] }
   0x2   :  { %10 = vst [vmem:[%s39_s1] sm:$0xff] %v8_v0  ;;  %11 = vst [vmem:[%s39_s1 + $0x8] sm:$0xff] %v9_v1 }

</bundles_post_ra>
